<compile_context>
chip_gen: v6e
topology: v6e:2x2x1
jax: 0.10.0
libtpu: 0.0.40
codegen_flags: <defaults>
</compile_context>

<pallas_src>
import jax
import jax.numpy as jnp
import numpy as np
from jax.experimental import pallas as pl
from jax.experimental.pallas import tpu as pltpu


_VMEM_BUDGET = 40 * 1024 * 1024   # tile-sizing budget (headroom under limit)
_VMEM_LIMIT = 48 * 1024 * 1024    # scoped VMEM limit: < v7x 64 MiB physical


def _round_up(x, m):
    return ((x + m - 1) // m) * m


# --------------------------------------------------------------------------
# Kernels
# --------------------------------------------------------------------------
def _make_pool_kernel(total_seq, ts):
    """multi_prediction=False: streamed mean over seq, then Linear->ReLU->Linear."""
    inv_seq = 1.0 / float(total_seq)
    needs_mask = (total_seq % ts) != 0

    def kernel(x_ref, w1_ref, b1_ref, w2_ref, b2_ref, o_ref, acc_ref):
        k = pl.program_id(1)

        @pl.when(k == 0)
        def _():
            acc_ref[...] = jnp.zeros_like(acc_ref)

        x = x_ref[...]                                    # (tb, ts, feat), native dtype
        if needs_mask:
            # Mask out padded seq rows of the (possibly partial) last block.
            seq_pos = k * ts + jax.lax.broadcasted_iota(jnp.int32, x.shape, 1)
            x = jnp.where(seq_pos < total_seq, x, jnp.zeros_like(x))

        # Per-tile partial sum accumulated in a f32 VMEM scratch.
        acc_ref[...] += jnp.sum(x.astype(jnp.float32), axis=1)

        @pl.when(k == pl.num_programs(1) - 1)
        def _():
            pooled = acc_ref[...] * inv_seq               # (tb, feat) f32  (mean)
            h = jnp.dot(pooled.astype(w1_ref.dtype), w1_ref[...],
                        preferred_element_type=jnp.float32) + b1_ref[...]
            h = jnp.maximum(h, 0.0)                       # ReLU
            out = jnp.dot(h.astype(w2_ref.dtype), w2_ref[...],
                          preferred_element_type=jnp.float32) + b2_ref[...]
            o_ref[...] = out.astype(o_ref.dtype)

    return kernel


def _mlp_tokenwise_kernel(x_ref, w1_ref, b1_ref, w2_ref, b2_ref, o_ref):
    """multi_prediction=True: per-row Linear->ReLU->Linear on (tm, feat)."""
    x = x_ref[...]                                        # native dtype -> MXU
    h = jnp.dot(x, w1_ref[...],
                preferred_element_type=jnp.float32) + b1_ref[...]
    h = jnp.maximum(h, 0.0)
    out = jnp.dot(h.astype(w2_ref.dtype), w2_ref[...],
                  preferred_element_type=jnp.float32) + b2_ref[...]
    o_ref[...] = out.astype(o_ref.dtype)


# --------------------------------------------------------------------------
# Tile sizing helpers
# --------------------------------------------------------------------------
def _pick_row_tile(n_rows, feat, tpad, x_bytes, w_bytes, o_bytes):
    # Resident: weights/biases; double-buffered: input rows + output rows.
    fixed = (feat * feat + feat * tpad + feat + tpad) * w_bytes
    per_row = 2 * feat * x_bytes + 2 * tpad * o_bytes
    avail = max(_VMEM_BUDGET - fixed, 8 * per_row)
    tm = min(n_rows, 1024, avail // per_row)
    if tm >= n_rows:
        return n_rows
    return max(8, (tm // 8) * 8)


def _pick_seq_tile(tb, s, feat, tpad, x_bytes, w_bytes, o_bytes):
    fixed = (feat * feat + feat * tpad + feat + tpad) * w_bytes
    fixed += tb * feat * 4                 # f32 accumulator scratch
    fixed += 2 * tb * tpad * o_bytes       # output buffers
    per_seq_row = 2 * tb * feat * x_bytes  # double-buffered input tile
    avail = max(_VMEM_BUDGET - fixed, 8 * per_seq_row)
    ts = min(s, 512, avail // per_seq_row)
    if ts >= s:
        return s
    return max(8, (ts // 8) * 8)


# --------------------------------------------------------------------------
# Wrapper
# --------------------------------------------------------------------------
def mlp_head_forward(seq, params, *, multi_prediction):
    """Pallas implementation of MLPHead.forward (hparams.head.mlp=True).

    seq:    (bs, seq_len, model_dim)
    params: (w1 (D,D), b1 (1,D), w2 (D,T), b2 (1,T))   [bias=False -> pass b2=0]
    """
    w1, b1, w2, b2 = params
    bs, s, feat = seq.shape
    model_dim = w1.shape[0]
    target_dim = w2.shape[1]
    assert feat == model_dim

    x_bytes = jnp.dtype(seq.dtype).itemsize
    w_bytes = jnp.dtype(w1.dtype).itemsize
    o_bytes = jnp.dtype(seq.dtype).itemsize

    # Lane-dense output: pad target_dim up to a multiple of 128, slice after.
    tpad = max(128, _round_up(target_dim, 128))
    if tpad != target_dim:
        w2p = jnp.pad(w2, ((0, 0), (0, tpad - target_dim)))
        b2p = jnp.pad(b2, ((0, 0), (0, tpad - target_dim)))
    else:
        w2p, b2p = w2, b2

    weight_bytes = (model_dim * model_dim + model_dim
                    + model_dim * tpad + tpad) * w_bytes

    if not multi_prediction:
        # ---- pooled head: stream seq tiles, accumulate sum in VMEM scratch ----
        tb = bs if bs <= 128 else 128
        ts = _pick_seq_tile(tb, s, feat, tpad, x_bytes, w_bytes, o_bytes)
        grid = (pl.cdiv(bs, tb), pl.cdiv(s, ts))

        weight_specs = [
            pl.BlockSpec((model_dim, model_dim), lambda i, k: (0, 0)),
            pl.BlockSpec((1, model_dim), lambda i, k: (0, 0)),
            pl.BlockSpec((model_dim, tpad), lambda i, k: (0, 0)),
            pl.BlockSpec((1, tpad), lambda i, k: (0, 0)),
        ]
        cost = pl.CostEstimate(
            flops=bs * s * feat + 2 * bs * model_dim * model_dim
                  + 2 * bs * model_dim * tpad,
            transcendentals=0,
            bytes_accessed=bs * s * feat * x_bytes + weight_bytes
                           + bs * tpad * o_bytes,
        )

        out_pad = pl.pallas_call(
            _make_pool_kernel(s, ts),
            out_shape=jax.ShapeDtypeStruct((bs, tpad), seq.dtype),
            grid=grid,
            in_specs=[pl.BlockSpec((tb, ts, feat), lambda i, k: (i, k, 0))]
                     + weight_specs,
            out_specs=pl.BlockSpec((tb, tpad), lambda i, k: (i, 0)),
            scratch_shapes=[pltpu.VMEM((tb, feat), jnp.float32)],
            compiler_params=pltpu.CompilerParams(
                dimension_semantics=("parallel", "arbitrary"),
                vmem_limit_bytes=_VMEM_LIMIT),
            cost_estimate=cost,
        )(seq, w1, b1, w2p, b2p)
        return out_pad[:, :target_dim]

    else:
        # ---- tokenwise head: flatten (bs, seq) -> rows, big row tiles ----
        n = bs * s
        x2d = seq.reshape(n, feat)
        tm = _pick_row_tile(n, feat, tpad, x_bytes, w_bytes, o_bytes)
        grid = (pl.cdiv(n, tm),)

        weight_specs = [
            pl.BlockSpec((model_dim, model_dim), lambda i: (0, 0)),
            pl.BlockSpec((1, model_dim), lambda i: (0, 0)),
            pl.BlockSpec((model_dim, tpad), lambda i: (0, 0)),
            pl.BlockSpec((1, tpad), lambda i: (0, 0)),
        ]
        cost = pl.CostEstimate(
            flops=2 * n * model_dim * model_dim + 2 * n * model_dim * tpad,
            transcendentals=0,
            bytes_accessed=n * feat * x_bytes + weight_bytes
                           + n * tpad * o_bytes,
        )

        out_pad = pl.pallas_call(
            _mlp_tokenwise_kernel,
            out_shape=jax.ShapeDtypeStruct((n, tpad), seq.dtype),
            grid=grid,
            in_specs=[pl.BlockSpec((tm, feat), lambda i: (i, 0))] + weight_specs,
            out_specs=pl.BlockSpec((tm, tpad), lambda i: (i, 0)),
            compiler_params=pltpu.CompilerParams(
                dimension_semantics=("parallel",),
                vmem_limit_bytes=_VMEM_LIMIT),
            cost_estimate=cost,
        )(x2d, w1, b1, w2p, b2p)
        return out_pad[:, :target_dim].reshape(bs, s, target_dim)


# --------------------------------------------------------------------------
# Test harness
# --------------------------------------------------------------------------
def _init_params(key, model_dim, target_dim, bias=True):
    # Deterministic synthetic init (PyTorch-Linear-like uniform ranges).
    k1, k2, k3, k4 = jax.random.split(key, 4)
    lim1 = 1.0 / np.sqrt(model_dim)
    w1 = jax.random.uniform(k1, (model_dim, model_dim), jnp.float32, -lim1, lim1)
    b1 = jax.random.uniform(k2, (1, model_dim), jnp.float32, -lim1, lim1)
    w2 = jax.random.uniform(k3, (model_dim, target_dim), jnp.float32, -lim1, lim1)
    if bias:
        b2 = jax.random.uniform(k4, (1, target_dim), jnp.float32, -lim1, lim1)
    else:
        b2 = jnp.zeros((1, target_dim), jnp.float32)   # hparams.head.bias=False
    return w1, b1, w2, b2


def _reference(seq, params, multi_prediction):
    w1, b1, w2, b2 = params
    x = seq if multi_prediction else jnp.mean(seq, axis=1)
    h = jnp.maximum(x @ w1 + b1[0], 0.0)
    return h @ w2 + b2[0]


if __name__ == "__main__":
    bs, seq_len, model_dim, target_dim = 2, 8, 32, 8
    key = jax.random.PRNGKey(0)
    kx, kp = jax.random.split(key)
    seq = jax.random.normal(kx, (bs, seq_len, model_dim), jnp.float32)
    params = _init_params(kp, model_dim, target_dim, bias=True)

    # multi_prediction = False  (global pooled head) -> (bs, target_dim)
    out_pool = jax.block_until_ready(
        mlp_head_forward(seq, params, multi_prediction=False))
    ref_pool = _reference(seq, params, False)
    np.testing.assert_allclose(np.asarray(out_pool), np.asarray(ref_pool),
                               rtol=1e-5, atol=1e-5)
    assert out_pool.shape == (bs, target_dim)

    # multi_prediction = True  (per-timestep head) -> (bs, seq, target_dim)
    out_multi = jax.block_until_ready(
        mlp_head_forward(seq, params, multi_prediction=True))
    ref_multi = _reference(seq, params, True)
    np.testing.assert_allclose(np.asarray(out_multi), np.asarray(ref_multi),
                               rtol=1e-5, atol=1e-5)
    assert out_multi.shape == (bs, seq_len, target_dim)

    print("KERNEL_OK")
</pallas_src>

<mosaic_0001>
module attributes {stable_mosaic.version = 11 : i64} {
  func.func @kernel(%arg0: i32, %arg1: i32, %arg2: memref<2x8x32xf32, #tpu.memory_space<vmem>>, %arg3: memref<32x32xf32, #tpu.memory_space<vmem>>, %arg4: memref<1x32xf32, #tpu.memory_space<vmem>>, %arg5: memref<32x128xf32, #tpu.memory_space<vmem>>, %arg6: memref<1x128xf32, #tpu.memory_space<vmem>>, %arg7: memref<2x128xf32, #tpu.memory_space<vmem>>, %arg8: memref<2x32xf32, #tpu.memory_space<vmem>>) attributes {dimension_semantics = [#tpu.dimension_semantics<parallel>, #tpu.dimension_semantics<arbitrary>], iteration_bounds = array<i64: 1, 1>, scalar_prefetch = 0 : i64, scratch_operands = 1 : i64, tpu.core_type = #tpu.core_type<tc>, window_params = [{transform_indices = @transform_0, window_bounds = array<i64: 2, 8, 32>}, {pipeline_mode = #tpu.pipeline_mode<synchronous>, transform_indices = @transform_1, window_bounds = array<i64: 32, 32>}, {pipeline_mode = #tpu.pipeline_mode<synchronous>, transform_indices = @transform_2, window_bounds = array<i64: 1, 32>}, {pipeline_mode = #tpu.pipeline_mode<synchronous>, transform_indices = @transform_3, window_bounds = array<i64: 32, 128>}, {pipeline_mode = #tpu.pipeline_mode<synchronous>, transform_indices = @transform_4, window_bounds = array<i64: 1, 128>}, {transform_indices = @transform_5, window_bounds = array<i64: 2, 128>}]} {
    %c0_i32 = arith.constant 0 : i32
    %0 = arith.cmpi eq, %arg1, %c0_i32 : i32
    %1 = arith.extui %0 : i1 to i32
    %c0_i32_0 = arith.constant 0 : i32
    %2 = arith.cmpi ne, %1, %c0_i32_0 : i32
    scf.if %2 {
      %cst_9 = arith.constant 0.000000e+00 : f32
      %11 = vector.broadcast %cst_9 : f32 to vector<2x32xf32>
      %c0_10 = arith.constant 0 : index
      %c0_11 = arith.constant 0 : index
      %12 = vector.load %arg8[%c0_10, %c0_11] : memref<2x32xf32, #tpu.memory_space<vmem>>, vector<2x32xf32>
      tpu.vector_store %arg8[%c0_10, %c0_11], %11 {strides = array<i32>} : memref<2x32xf32, #tpu.memory_space<vmem>>, vector<2x32xf32>,
    } else {
    }
    %c0 = arith.constant 0 : index
    %c0_1 = arith.constant 0 : index
    %c0_2 = arith.constant 0 : index
    %3 = vector.load %arg2[%c0, %c0_1, %c0_2] : memref<2x8x32xf32, #tpu.memory_space<vmem>>, vector<2x8x32xf32>
    %c0_3 = arith.constant 0 : index
    %c0_4 = arith.constant 0 : index
    %4 = vector.load %arg8[%c0_3, %c0_4] : memref<2x32xf32, #tpu.memory_space<vmem>>, vector<2x32xf32>
    %cst = arith.constant dense<0.000000e+00> : vector<2x32xf32>
    %5 = vector.multi_reduction <add>, %3, %cst [1] : vector<2x8x32xf32> to vector<2x32xf32>
    %6 = arith.addf %4, %5 : vector<2x32xf32>
    %c0_5 = arith.constant 0 : index
    %c0_6 = arith.constant 0 : index
    %7 = vector.load %arg8[%c0_5, %c0_6] : memref<2x32xf32, #tpu.memory_space<vmem>>, vector<2x32xf32>
    tpu.vector_store %arg8[%c0_5, %c0_6], %6 {strides = array<i32>} : memref<2x32xf32, #tpu.memory_space<vmem>>, vector<2x32xf32>,
    %c0_i32_7 = arith.constant 0 : i32
    %8 = arith.cmpi eq, %arg1, %c0_i32_7 : i32
    %9 = arith.extui %8 : i1 to i32
    %c0_i32_8 = arith.constant 0 : i32
    %10 = arith.cmpi ne, %9, %c0_i32_8 : i32
    scf.if %10 {
      %c0_9 = arith.constant 0 : index
      %c0_10 = arith.constant 0 : index
      %11 = vector.load %arg8[%c0_9, %c0_10] : memref<2x32xf32, #tpu.memory_space<vmem>>, vector<2x32xf32>
      %cst_11 = arith.constant 1.250000e-01 : f32
      %12 = vector.broadcast %cst_11 : f32 to vector<2x32xf32>
      %13 = arith.mulf %11, %12 : vector<2x32xf32>
      %c0_12 = arith.constant 0 : index
      %c0_13 = arith.constant 0 : index
      %14 = vector.load %arg3[%c0_12, %c0_13] : memref<32x32xf32, #tpu.memory_space<vmem>>, vector<32x32xf32>
      %cst_14 = arith.constant dense<0.000000e+00> : vector<2x32xf32>
      %15 = tpu.matmul %13, %14, %cst_14 {dimension_numbers = #tpu.dot_dimension_numbers<[1], [0], [0], [1], [0, 0, 1, 1], [], []>} : vector<2x32xf32>, vector<32x32xf32>, vector<2x32xf32> -> vector<2x32xf32>
      %c0_15 = arith.constant 0 : index
      %c0_16 = arith.constant 0 : index
      %16 = vector.load %arg4[%c0_15, %c0_16] : memref<1x32xf32, #tpu.memory_space<vmem>>, vector<1x32xf32>
      %17 = vector.broadcast %16 : vector<1x32xf32> to vector<2x32xf32>
      %18 = arith.addf %15, %17 : vector<2x32xf32>
      %cst_17 = arith.constant 0.000000e+00 : f32
      %19 = vector.broadcast %cst_17 : f32 to vector<2x32xf32>
      %20 = arith.maximumf %18, %19 : vector<2x32xf32>
      %c0_18 = arith.constant 0 : index
      %c0_19 = arith.constant 0 : index
      %21 = vector.load %arg5[%c0_18, %c0_19] : memref<32x128xf32, #tpu.memory_space<vmem>>, vector<32x128xf32>
      %cst_20 = arith.constant dense<0.000000e+00> : vector<2x128xf32>
      %22 = tpu.matmul %20, %21, %cst_20 {dimension_numbers = #tpu.dot_dimension_numbers<[1], [0], [0], [1], [0, 0, 1, 1], [], []>} : vector<2x32xf32>, vector<32x128xf32>, vector<2x128xf32> -> vector<2x128xf32>
      %c0_21 = arith.constant 0 : index
      %c0_22 = arith.constant 0 : index
      %23 = vector.load %arg6[%c0_21, %c0_22] : memref<1x128xf32, #tpu.memory_space<vmem>>, vector<1x128xf32>
      %24 = vector.broadcast %23 : vector<1x128xf32> to vector<2x128xf32>
      %25 = arith.addf %22, %24 : vector<2x128xf32>
      %c0_23 = arith.constant 0 : index
      %c0_24 = arith.constant 0 : index
      %26 = vector.load %arg7[%c0_23, %c0_24] : memref<2x128xf32, #tpu.memory_space<vmem>>, vector<2x128xf32>
      tpu.vector_store %arg7[%c0_23, %c0_24], %25 {strides = array<i32>} : memref<2x128xf32, #tpu.memory_space<vmem>>, vector<2x128xf32>,
    } else {
    }
    return
  }
  func.func @transform_0(%arg0: i32, %arg1: i32) -> (i32, i32, i32) {
    %c0_i32 = arith.constant 0 : i32
    %c0_i32_0 = arith.constant 0 : i32
    return %arg0, %arg1, %c0_i32 : i32, i32, i32
  }
  func.func @transform_1(%arg0: i32, %arg1: i32) -> (i32, i32) {
    %c0_i32 = arith.constant 0 : i32
    %c0_i32_0 = arith.constant 0 : i32
    %c0_i32_1 = arith.constant 0 : i32
    return %c0_i32, %c0_i32_0 : i32, i32
  }
  func.func @transform_2(%arg0: i32, %arg1: i32) -> (i32, i32) {
    %c0_i32 = arith.constant 0 : i32
    %c0_i32_0 = arith.constant 0 : i32
    %c0_i32_1 = arith.constant 0 : i32
    return %c0_i32, %c0_i32_0 : i32, i32
  }
  func.func @transform_3(%arg0: i32, %arg1: i32) -> (i32, i32) {
    %c0_i32 = arith.constant 0 : i32
    %c0_i32_0 = arith.constant 0 : i32
    %c0_i32_1 = arith.constant 0 : i32
    return %c0_i32, %c0_i32_0 : i32, i32
  }
  func.func @transform_4(%arg0: i32, %arg1: i32) -> (i32, i32) {
    %c0_i32 = arith.constant 0 : i32
    %c0_i32_0 = arith.constant 0 : i32
    %c0_i32_1 = arith.constant 0 : i32
    return %c0_i32, %c0_i32_0 : i32, i32
  }
  func.func @transform_5(%arg0: i32, %arg1: i32) -> (i32, i32) {
    %c0_i32 = arith.constant 0 : i32
    %c0_i32_0 = arith.constant 0 : i32
    return %arg0, %c0_i32 : i32, i32
  }
}

</mosaic_0001>

<bundles_post_ra>
// kernel: tpu_custom_call.1
= control target key start
LH: loop header
LB: loop body
LE: loop exit
PB: predicated region body
PF: predicated region fallthrough
CT: control target
= control target key end

     0   :  { %10 = vsyncpa [#allocation4], 0  ;;  %s477_s0 = inlined_call_operand.hbm [shape: f32[2,8,32], index: 0, kind: input, shape index: {}]   ;;  %s478_s1 = inlined_call_operand.hbm [shape: f32[32,32], index: 1, kind: input, shape index: {}]   ;;  %s479_s2 = inlined_call_operand.vmem [shape: f32[1,32], index: 2, kind: input, shape index: {}]   ;;  %s480_s3 = inlined_call_operand.hbm [shape: f32[32,128], index: 3, kind: input, shape index: {}]   ;;  %s481_s4 = inlined_call_operand.vmem [shape: f32[1,128], index: 4, kind: input, shape index: {}]   ;;  %s482_s5 = inlined_call_operand.hbm [shape: f32[2,128], index: 5, kind: output, shape index: {}]  }
   0x1   :  { %11 = vsyncpa [#allocation7], 0 }
   0x2   :  { %12 = vsyncpa [#allocation5], 0  ;;  %s415_s18 = smov [#allocation6]   ;;  %s416_s20 = smov [#allocation3]  }
   0x3   :  { %s30_s19 = sshll.u32 %s415_s18, 4  ;;  %s18_s21 = sshll.u32 %s416_s20, 4  ;;  %s31_s19 = int_to_ptr.vmem [resolvable:$true] %s30_s19  ;;  %s19_s21 = int_to_ptr.vmem [resolvable:$true] %s18_s21 }
   0x4   :  { %s337_s22 = scalar_lea.vmem %s31_s19, 512  ;;  %p342_p1 = scmp.lt.s32.totalorder %s31_s19, %s31_s19 }
   0x5   :  { %p338_p0 = scmp.ne.s32.totalorder %s31_s19, %s337_s22  ;;  %p343_p2 = scmp.lt.s32.totalorder %s337_s22, %s337_s22 }
   0x7   :  { %p344_p3 = por %p343_p2, %p342_p1 }
   0x9   :  { %p345_p4 = pnand %p344_p3, %p338_p0 }
   0xb   :  { %348 = shalt.err (!%p345_p4)
}
   0xc   :  { %s417_s23 = smov 128   ;;  %s418_s24 = smov 8  }
   0xd   :  { %36 = dma.hbm_to_vmem [thread:$0]  %s478_s1, 512, %s31_s19, [#allocation7], %s417_s23, %s417_s23, %s418_s24  }
   0xe   :  { %s357_s27 = scalar_lea.vmem %s19_s21, 256  ;;  %p362_p6 = scmp.lt.s32.totalorder %s19_s21, %s19_s21 }
   0xf   :  { %p358_p5 = scmp.ne.s32.totalorder %s19_s21, %s357_s27  ;;  %p363_p7 = scmp.lt.s32.totalorder %s357_s27, %s357_s27 }
  0x11   :  { %p364_p8 = por %p363_p7, %p362_p6 }
  0x13   :  { %p365_p9 = pnand %p364_p8, %p358_p5 }
  0x15   :  { %368 = shalt.err (!%p365_p9)
}
  0x16   :  { %24 = dma.hbm_to_vmem [thread:$0]  %s477_s0, 256, %s19_s21, [#allocation4], %s417_s23, %s417_s23, %s418_s24  }
  0x17   :  { %s419_s30 = smov [#allocation8]  }
  0x18   :  { %s44_s6 = sshll.u32 %s419_s30, 4  ;;  %s45_s6 = int_to_ptr.vmem [resolvable:$true] %s44_s6 }
  0x19   :  { %s377_s7 = scalar_lea.vmem %s45_s6, 512  ;;  %p382_p11 = scmp.lt.s32.totalorder %s45_s6, %s45_s6 }
  0x1a   :  { %p378_p10 = scmp.ne.s32.totalorder %s45_s6, %s377_s7  ;;  %p383_p12 = scmp.lt.s32.totalorder %s377_s7, %s377_s7 }
  0x1c   :  { %p384_p13 = por %p383_p12, %p382_p11 }
  0x1e   :  { %p385_p0 = pnand %p384_p13, %p378_p10 }
  0x20   :  { %388 = shalt.err (!%p385_p0)
}
  0x21   :  { %50 = dma.hbm_to_vmem [thread:$0]  %s480_s3, 512, %s45_s6, [#allocation7], %s417_s23, %s417_s23, %s418_s24  }
  0x22   :  { %409 = dma.done.wait [#allocation4], 256  }
  0x23   :  { %410 = vsyncadd [#allocation4], 4294967040 }
  0x24   :  { %411 = dma.done.wait [#allocation7], 1024  }
  0x25   :  { %412 = vsyncadd [#allocation7], 4294966272  ;;  %vm66_vm0 = vcmask 254976   ;;  %v420_v0 = vmov 0.0   ;;  %vm421_vm1 = vmmov 0   ;;  %vm71_vm2 = vcmask 261120  }
  0x26   :  { %299 = vmatprep.subr.mxu0 %v420_v0  ;;  %307 = vmatprep.mubr.msk.f32.mxu0 %vm421_vm1, %v420_v0  ;;  %67 = vst.msk [vmem:[#allocation2] sm:$0x3] %vm66_vm0, %v420_v0  ;;  %v102_v1 = vld [vmem:[#allocation6 + $0x18] sm:$0xff]  ;;  %v101_v2 = vld [vmem:[#allocation6 + $0x10] sm:$0xff]  ;;  %v100_v5 = vld [vmem:[#allocation6 + $0x8] sm:$0xff]  ;;  %vm88_vm3 = vcmask 1041409  }
  0x27   :  { %310 = vmatprep.subr.mxu1 %v420_v0  ;;  %318 = vmatprep.mubr.msk.f32.mxu1 %vm421_vm1, %v420_v0  ;;  %v68_v3 = vld [vmem:[#allocation3] sm:$0xff]  ;;  %v69_v4 = vld [vmem:[#allocation3 + $0x8] sm:$0xff]  ;;  %v99_v11 = vld [vmem:[#allocation6] sm:$0xff]  ;;  %s422_s11 = smov [#allocation9]  }
  0x28   :  { %300 = vmatpush3.msra.mxu0 %v102_v1  ;;  %v72_v6 = vsel %vm71_vm2, %v68_v3, 0.0  ;;  %v79_v7 = vsel %vm71_vm2, %v69_v4, 0.0  ;;  %v187_v8 = vld [vmem:[#allocation8 + $0x18] sm:$0xff]  ;;  %v186_v27 = vld [vmem:[#allocation8 + $0x10] sm:$0xff]  ;;  %v185_v28 = vld [vmem:[#allocation8 + $0x8] sm:$0xff]  ;;  %s275_s12 = sshll.u32 %s422_s11, 4  ;;  %s276_s12 = int_to_ptr.vmem [resolvable:$true] %s275_s12 }
  0x29   :  { %301 = vmatprep.subr.mxu0 %v420_v0  ;;  %v73_v9 = vrot.slane %v72_v6, 4  ;;  %v80_v10 = vrot.slane %v79_v7, 4  ;;  %311 = vmatpush3.msra.mxu1 %v187_v8  ;;  %v184_v29 = vld [vmem:[#allocation8] sm:$0xff]  ;;  %v285_v30 = vld [vmem:[%s479_s2] ss:$0 sm:$0xff]  ;;  %s389_s13 = scalar_lea.vmem %s276_s12, 32  ;;  %p394_p2 = scmp.lt.s32.totalorder %s276_s12, %s276_s12 }
  0x2a   :  { %302 = vmatpush3.msra.mxu0 %v101_v2  ;;  %312 = vmatprep.subr.mxu1 %v420_v0  ;;  %v287_v35 = vld [vmem:[%s481_s4] ss:$0 sm:$0xff]  ;;  %p390_p1 = scmp.ne.s32.totalorder %s276_s12, %s389_s13  ;;  %p395_p3 = scmp.lt.s32.totalorder %s389_s13, %s389_s13 }
  0x2b   :  { %303 = vmatprep.subr.mxu0 %v420_v0  ;;  %v74_v12 = vadd.f32 %v73_v9, %v72_v6  ;;  %v81_v13 = vadd.f32 %v80_v10, %v79_v7  ;;  %313 = vmatpush3.msra.mxu1 %v186_v27 }
  0x2c   :  { %304 = vmatpush3.msra.mxu0 %v100_v5  ;;  %314 = vmatprep.subr.mxu1 %v420_v0  ;;  %p396_p4 = por %p395_p3, %p394_p2 }
  0x2d   :  { %305 = vmatprep.subr.mxu0 %v420_v0  ;;  %v75_v14 = vrot.slane %v74_v12, 2  ;;  %v82_v15 = vrot.slane %v81_v13, 2  ;;  %v70_v20 = vld [vmem:[#allocation2] sm:$0x3]  ;;  %315 = vmatpush3.msra.mxu1 %v185_v28 }
  0x2e   :  { %306 = vmatpush3.msra.mxu0 %v99_v11  ;;  %316 = vmatprep.subr.mxu1 %v420_v0  ;;  %p397_p5 = pnand %p396_p4, %p390_p1 }
  0x2f   :  { %v76_v16 = vadd.f32 %v75_v14, %v74_v12  ;;  %v83_v17 = vadd.f32 %v82_v15, %v81_v13  ;;  %317 = vmatpush3.msra.mxu1 %v184_v29 }
  0x31   :  { %v77_v18 = vrot.slane %v76_v16, 1  ;;  %v84_v19 = vrot.slane %v83_v17, 1 }
  0x33   :  { %v78_v21 = vadd.f32 %v77_v18, %v76_v16  ;;  %v85_v22 = vadd.f32 %v84_v19, %v83_v17 }
  0x35   :  { %v89_v23 = vsel %vm88_vm3, %v85_v22, %v78_v21 }
  0x36   :  { %v91_v24 = vadd.f32 %v89_v23, %v70_v20 }
  0x38   :  { %93 = vst.msk [vmem:[#allocation2] sm:$0x3] %vm66_vm0, %v91_v24 }
  0x3f   :  { %v97_v25 = vld [vmem:[#allocation2] sm:$0x3] }
  0x40   :  { %v98_v26 = vmul.f32 0.125, %v97_v25 }
  0x42   :  { %308 = vmatmul.mubr.msk.f32.vlgmr.msra.gmra.mxu0 %vm71_vm2, %v98_v26 }
 0x102   :  { %v179_v31 = vpop.f32.mrf.mxu0 }
 0x103   :  { %v180_v32 = vadd.f32 %v285_v30, %v179_v31 }
 0x104   :  { %v309_v33 = vpop.f32.mrf.mxu0 }
 0x105   :  { %v183_v34 = vmax.f32 %v180_v32, 0.0 }
 0x107   :  { %319 = vmatmul.mubr.msk.f32.vlgmr.msra.gmra.mxu1 %vm71_vm2, %v183_v34 }
 0x1c7   :  { %v264_v36 = vpop.f32.mrf.mxu1 }
 0x1c8   :  { %v265_v37 = vadd.f32 %v287_v35, %v264_v36 }
 0x1c9   :  { %v320_v38 = vpop.f32.mrf.mxu1 }
 0x1ca   :  { %268 = vst [vmem:[#allocation9] sm:$0x3] %v265_v37 }
 0x1cb   :  { %400 = shalt.err (!%p397_p5)
}
 0x1cc   :  { %278 = dma.vmem_to_hbm [thread:$0]  %s276_s12, 32, %s482_s5, [#allocation5]  }
 0x1cd   :  { %413 = dma.done.wait [#allocation5], 32  }
 0x1ce   :  { %414 = vsyncadd [#allocation5], 4294967264 }
 0x1cf   :  { %282 = vsyncpa [#allocation4], 1 }
 0x1d0   :  { %283 = vsyncpa [#allocation7], 1 }
 0x1d1   :  { %284 = vsyncpa [#allocation5], 1 }

</bundles_post_ra>
